<compile_context>
chip_gen: v6e
topology: v6e:2x2x1
jax: 0.10.0
libtpu: 0.0.40
codegen_flags: <defaults>
</compile_context>

<pallas_src>
import functools

import jax
import jax.numpy as jnp
import numpy as np
from jax.experimental import pallas as pl
from jax.experimental.pallas import tpu as pltpu


# ---------------------------------------------------------------------------
# Fused Pallas kernel: image head + text head + normalize + scaled similarity
# ---------------------------------------------------------------------------

def _fused_clip_kernel(pooled_img_ref, w_patch_ref, b_patch_ref, w_head_ref,
                       b_head_ref, txt_static_ref, ctx_ref, inv_len_ref,
                       w_proj_ref, b_proj_ref, scale_ref, out_ref):
    """Single invocation; every operand is small and fully VMEM-resident."""
    # ---- image tower (synthetic linear stand-in for ViT-B/16) --------------
    # pooled_img is the spatially mean-pooled raw patch vector (linearity of the
    # patch-embed matmul: mean_P(x) @ W + b == mean_P(x @ W + b)).
    tok = jnp.dot(pooled_img_ref[...].astype(jnp.bfloat16), w_patch_ref[...],
                  preferred_element_type=jnp.float32) + b_patch_ref[...]       # (B, D)
    img = jnp.dot(tok.astype(jnp.bfloat16), w_head_ref[...],
                  preferred_element_type=jnp.float32) + b_head_ref[...]        # (B, E)

    # ---- text tower: masked mean pool of [prefix, ctx, suffix] + projection -
    # prefix + masked-suffix sums are pre-reduced outside (frozen); only the
    # learnable ctx contribution (one shared row) is added here.
    ctx_sum = jnp.sum(ctx_ref[...], axis=0, keepdims=True)                     # (1, D)
    pooled_txt = (txt_static_ref[...] + ctx_sum) * inv_len_ref[...]            # (n_cls, D)
    txt = jnp.dot(pooled_txt.astype(jnp.bfloat16), w_proj_ref[...],
                  preferred_element_type=jnp.float32) + b_proj_ref[...]        # (n_cls, E)

    # ---- L2-normalize + scaled cosine-similarity logits ---------------------
    # exp(logit_scale) (SMEM scalar) is folded into the image rsqrt factor so no
    # separate (B, n_cls) elementwise pass is needed at the end.
    scale = scale_ref[0, 0]
    img_n = img * (scale * jax.lax.rsqrt(jnp.sum(img * img, axis=-1, keepdims=True)))
    txt_n = txt * jax.lax.rsqrt(jnp.sum(txt * txt, axis=-1, keepdims=True))
    # Contract on the shared embedding dim directly (no .T relayout of txt_n).
    out_ref[...] = jax.lax.dot_general(
        img_n, txt_n, dimension_numbers=(((1,), (1,)), ((), ())),
        preferred_element_type=jnp.float32)                                    # (B, n_cls)


# ---------------------------------------------------------------------------
# Wrapper (cheap XLA glue + pallas_call plumbing)
# ---------------------------------------------------------------------------

def clip_test_time_tuning_forward(image, params, *, ps):
    """ClipTestTimeTuning.forward(image) with a 4-D input -> inference(image)."""
    B, C, H, W = image.shape
    gh, gw = H // ps, W // ps
    patch_dim = C * ps * ps

    D = params["w_patch"].shape[1]
    E = params["w_head"].shape[1]
    n_cls = params["token_prefix"].shape[0]
    n_ctx = params["ctx"].shape[0]

    # --- image-side pre-pool (review #1) -------------------------------------
    # Mean over the (gh, gw) patch grid on the FREE view of the contiguous NCHW
    # image: one XLA reduce, reads the image exactly once, writes only (B, C, ps, ps).
    # The result is already channel-major (c, i, j), matching w_patch's row order,
    # so no transpose / weight reordering is ever materialized.
    pooled_img = jnp.mean(image.reshape(B, C, gh, ps, gw, ps), axis=(2, 4))
    pooled_img = pooled_img.reshape(B, patch_dim).astype(jnp.float32)          # (B, patch_dim)

    # --- text-side pre-reduction (review #2) ---------------------------------
    # prefix / suffix embeddings and attn_mask are frozen (image- and ctx-independent),
    # so fold them into a single (n_cls, D) tensor outside the kernel.
    attn_mask = params["attn_mask"]                                            # (n_cls, L)
    suffix_mask = attn_mask[:, 1 + n_ctx:]                                     # (n_cls, suf_len)
    txt_static = (params["token_prefix"].reshape(n_cls, D)
                  + jnp.sum(params["token_suffix"] * suffix_mask[:, :, None], axis=1))
    inv_len = 1.0 / jnp.sum(attn_mask, axis=1, keepdims=True)                  # (n_cls, 1)

    exp_scale = jnp.exp(params["logit_scale"]).astype(jnp.float32).reshape(1, 1)

    # bf16 weights for the MXU; biases / epilogue stay f32.
    w_patch = params["w_patch"].astype(jnp.bfloat16)
    w_head = params["w_head"].astype(jnp.bfloat16)
    w_proj = params["w_proj"].astype(jnp.bfloat16)
    b_patch = params["b_patch"].reshape(1, D)
    b_head = params["b_head"].reshape(1, E)
    b_proj = params["b_proj"].reshape(1, E)

    vmem = pl.BlockSpec(memory_space=pltpu.MemorySpace.VMEM)   # whole array, resident
    smem = pl.BlockSpec(memory_space=pltpu.MemorySpace.SMEM)   # (1,1) scalar

    return pl.pallas_call(
        _fused_clip_kernel,
        out_shape=jax.ShapeDtypeStruct((B, n_cls), jnp.float32),
        in_specs=[
            vmem,   # pooled_img  (B, patch_dim) f32
            vmem,   # w_patch     (patch_dim, D) bf16
            vmem,   # b_patch     (1, D)
            vmem,   # w_head      (D, E) bf16
            vmem,   # b_head      (1, E)
            vmem,   # txt_static  (n_cls, D)  = prefix + masked suffix sum
            vmem,   # ctx         (n_ctx, D)
            vmem,   # inv_len     (n_cls, 1)
            vmem,   # w_proj      (D, E) bf16
            vmem,   # b_proj      (1, E)
            smem,   # exp(logit_scale) (1, 1)
        ],
        out_specs=vmem,
        compiler_params=pltpu.CompilerParams(
            vmem_limit_bytes=32 * 1024 * 1024),   # explicit, safe on v5e/v6e/v7x
    )(pooled_img, w_patch, b_patch, w_head, b_head, txt_static, params["ctx"],
      inv_len, w_proj, b_proj, exp_scale)


# ---------------------------------------------------------------------------
# Pure-JAX reference (same math / same bf16 matmul inputs) for validation
# ---------------------------------------------------------------------------

def _reference_forward(image, params, *, ps):
    f32, bf16 = jnp.float32, jnp.bfloat16
    B, C, H, W = image.shape
    gh, gw = H // ps, W // ps
    patches = image.reshape(B, C, gh, ps, gw, ps)
    patches = jnp.transpose(patches, (0, 2, 4, 1, 3, 5)).reshape(B, gh * gw, -1)
    n_ctx = params["ctx"].shape[0]

    pooled_img = jnp.mean(patches, axis=1)
    tok = jnp.dot(pooled_img.astype(bf16), params["w_patch"].astype(bf16),
                  preferred_element_type=f32) + params["b_patch"]
    img = jnp.dot(tok.astype(bf16), params["w_head"].astype(bf16),
                  preferred_element_type=f32) + params["b_head"]

    attn_mask = params["attn_mask"]
    prefix = params["token_prefix"][:, 0, :]
    ctx_sum = jnp.sum(params["ctx"], axis=0, keepdims=True)
    smask = attn_mask[:, 1 + n_ctx:]
    suffix_sum = jnp.sum(params["token_suffix"] * smask[:, :, None], axis=1)
    pooled_txt = (prefix + ctx_sum + suffix_sum) / jnp.sum(attn_mask, axis=1,
                                                           keepdims=True)
    txt = jnp.dot(pooled_txt.astype(bf16), params["w_proj"].astype(bf16),
                  preferred_element_type=f32) + params["b_proj"]

    img_n = img / jnp.linalg.norm(img, axis=-1, keepdims=True)
    txt_n = txt / jnp.linalg.norm(txt, axis=-1, keepdims=True)
    return jnp.exp(params["logit_scale"]) * (img_n @ txt_n.T)


# ---------------------------------------------------------------------------
# Deterministic synthetic parameter construction + demo
# ---------------------------------------------------------------------------

def make_params(key, *, n_cls, n_ctx, seq_len, ctx_dim, embed_dim, patch_dim):
    ks = jax.random.split(key, 8)
    suffix_len = seq_len - 1 - n_ctx
    params = {
        # PromptLearner: ctx ~ N(0, 0.02), prefix/suffix = frozen token embeddings.
        "ctx": 0.02 * jax.random.normal(ks[0], (n_ctx, ctx_dim), jnp.float32),
        "token_prefix": 0.02 * jax.random.normal(ks[1], (n_cls, 1, ctx_dim), jnp.float32),
        "token_suffix": 0.02 * jax.random.normal(ks[2], (n_cls, suffix_len, ctx_dim), jnp.float32),
        # Image tower (synthetic): patch embed + head projection.
        "w_patch": 0.02 * jax.random.normal(ks[3], (patch_dim, ctx_dim), jnp.float32),
        "b_patch": jnp.zeros((ctx_dim,), jnp.float32),
        "w_head": 0.02 * jax.random.normal(ks[4], (ctx_dim, embed_dim), jnp.float32),
        "b_head": jnp.zeros((embed_dim,), jnp.float32),
        # Text tower (synthetic): pooled projection.
        "w_proj": 0.02 * jax.random.normal(ks[5], (ctx_dim, embed_dim), jnp.float32),
        "b_proj": jnp.zeros((embed_dim,), jnp.float32),
        # CLIP logit scale, init ln(1/0.07) as in open_clip.
        "logit_scale": jnp.asarray(jnp.log(1.0 / 0.07), jnp.float32),
    }
    # Synthetic tokenizer attention mask: class i has (1 + n_ctx + 2 + 2*i) valid tokens.
    lengths = jnp.asarray([1 + n_ctx + 2 + 2 * i for i in range(n_cls)], jnp.int32)
    pos = jnp.arange(seq_len, dtype=jnp.int32)
    params["attn_mask"] = (pos[None, :] < lengths[:, None]).astype(jnp.float32)
    return params


if __name__ == "__main__":
    # Small shapes consistent with the module's dataflow (real model: ctx_dim=768,
    # context_length=256, ViT-B/16; scaled down but structurally identical).
    B, C, H, W = 2, 4, 16, 16
    ps = 8
    n_cls, n_ctx, seq_len = 4, 16, 32
    ctx_dim, embed_dim = 128, 128
    patch_dim = C * ps * ps

    key = jax.random.PRNGKey(0)
    k_img, k_par = jax.random.split(key)
    image = jax.random.normal(k_img, (B, C, H, W), jnp.float32)   # NCHW input
    params = make_params(k_par, n_cls=n_cls, n_ctx=n_ctx, seq_len=seq_len,
                         ctx_dim=ctx_dim, embed_dim=embed_dim, patch_dim=patch_dim)

    fwd = jax.jit(functools.partial(clip_test_time_tuning_forward, ps=ps))
    logits = jax.block_until_ready(fwd(image, params))
    assert logits.shape == (B, n_cls), logits.shape
    assert bool(jnp.all(jnp.isfinite(logits)))

    ref = jax.block_until_ready(_reference_forward(image, params, ps=ps))
    np.testing.assert_allclose(np.asarray(logits), np.asarray(ref),
                               rtol=1e-2, atol=1e-2)
    print("KERNEL_OK")
</pallas_src>

<mosaic_0001>
module attributes {stable_mosaic.version = 11 : i64} {
  func.func @_fused_clip_kernel(%arg0: memref<2x256xf32, #tpu.memory_space<vmem>>, %arg1: memref<256x128xbf16, #tpu.memory_space<vmem>>, %arg2: memref<1x128xf32, #tpu.memory_space<vmem>>, %arg3: memref<128x128xbf16, #tpu.memory_space<vmem>>, %arg4: memref<1x128xf32, #tpu.memory_space<vmem>>, %arg5: memref<4x128xf32, #tpu.memory_space<vmem>>, %arg6: memref<16x128xf32, #tpu.memory_space<vmem>>, %arg7: memref<4x1xf32, #tpu.memory_space<vmem>>, %arg8: memref<128x128xbf16, #tpu.memory_space<vmem>>, %arg9: memref<1x128xf32, #tpu.memory_space<vmem>>, %arg10: memref<1x1xf32, #tpu.memory_space<smem>>, %arg11: memref<2x4xf32, #tpu.memory_space<vmem>>) attributes {dimension_semantics = [], scalar_prefetch = 0 : i64, scratch_operands = 0 : i64, tpu.core_type = #tpu.core_type<tc>} {
    %c0 = arith.constant 0 : index
    %c0_0 = arith.constant 0 : index
    %0 = vector.load %arg0[%c0, %c0_0] : memref<2x256xf32, #tpu.memory_space<vmem>>, vector<2x256xf32>
    %1 = arith.truncf %0 : vector<2x256xf32> to vector<2x256xbf16>
    %c0_1 = arith.constant 0 : index
    %c0_2 = arith.constant 0 : index
    %2 = vector.load %arg1[%c0_1, %c0_2] : memref<256x128xbf16, #tpu.memory_space<vmem>>, vector<256x128xbf16>
    %cst = arith.constant dense<0.000000e+00> : vector<2x128xf32>
    %3 = tpu.matmul %1, %2, %cst {dimension_numbers = #tpu.dot_dimension_numbers<[1], [0], [0], [1], [0, 0, 1, 1], [], []>} : vector<2x256xbf16>, vector<256x128xbf16>, vector<2x128xf32> -> vector<2x128xf32>
    %c0_3 = arith.constant 0 : index
    %c0_4 = arith.constant 0 : index
    %4 = vector.load %arg2[%c0_3, %c0_4] : memref<1x128xf32, #tpu.memory_space<vmem>>, vector<1x128xf32>
    %5 = vector.broadcast %4 : vector<1x128xf32> to vector<2x128xf32>
    %6 = arith.addf %3, %5 : vector<2x128xf32>
    %7 = arith.truncf %6 : vector<2x128xf32> to vector<2x128xbf16>
    %c0_5 = arith.constant 0 : index
    %c0_6 = arith.constant 0 : index
    %8 = vector.load %arg3[%c0_5, %c0_6] : memref<128x128xbf16, #tpu.memory_space<vmem>>, vector<128x128xbf16>
    %cst_7 = arith.constant dense<0.000000e+00> : vector<2x128xf32>
    %9 = tpu.matmul %7, %8, %cst_7 {dimension_numbers = #tpu.dot_dimension_numbers<[1], [0], [0], [1], [0, 0, 1, 1], [], []>} : vector<2x128xbf16>, vector<128x128xbf16>, vector<2x128xf32> -> vector<2x128xf32>
    %c0_8 = arith.constant 0 : index
    %c0_9 = arith.constant 0 : index
    %10 = vector.load %arg4[%c0_8, %c0_9] : memref<1x128xf32, #tpu.memory_space<vmem>>, vector<1x128xf32>
    %11 = vector.broadcast %10 : vector<1x128xf32> to vector<2x128xf32>
    %12 = arith.addf %9, %11 : vector<2x128xf32>
    %c0_10 = arith.constant 0 : index
    %c0_11 = arith.constant 0 : index
    %13 = vector.load %arg6[%c0_10, %c0_11] : memref<16x128xf32, #tpu.memory_space<vmem>>, vector<16x128xf32>
    %cst_12 = arith.constant dense<0.000000e+00> : vector<128xf32>
    %14 = vector.multi_reduction <add>, %13, %cst_12 [0] : vector<16x128xf32> to vector<128xf32>
    %15 = vector.shape_cast %14 : vector<128xf32> to vector<1x128xf32>
    %c0_13 = arith.constant 0 : index
    %c0_14 = arith.constant 0 : index
    %16 = vector.load %arg5[%c0_13, %c0_14] : memref<4x128xf32, #tpu.memory_space<vmem>>, vector<4x128xf32>
    %17 = vector.broadcast %15 : vector<1x128xf32> to vector<4x128xf32>
    %18 = arith.addf %16, %17 : vector<4x128xf32>
    %c0_15 = arith.constant 0 : index
    %c0_16 = arith.constant 0 : index
    %19 = vector.load %arg7[%c0_15, %c0_16] : memref<4x1xf32, #tpu.memory_space<vmem>>, vector<4x1xf32>
    %20 = vector.broadcast %19 : vector<4x1xf32> to vector<4x128xf32>
    %21 = arith.mulf %18, %20 : vector<4x128xf32>
    %22 = arith.truncf %21 : vector<4x128xf32> to vector<4x128xbf16>
    %c0_17 = arith.constant 0 : index
    %c0_18 = arith.constant 0 : index
    %23 = vector.load %arg8[%c0_17, %c0_18] : memref<128x128xbf16, #tpu.memory_space<vmem>>, vector<128x128xbf16>
    %cst_19 = arith.constant dense<0.000000e+00> : vector<4x128xf32>
    %24 = tpu.matmul %22, %23, %cst_19 {dimension_numbers = #tpu.dot_dimension_numbers<[1], [0], [0], [1], [0, 0, 1, 1], [], []>} : vector<4x128xbf16>, vector<128x128xbf16>, vector<4x128xf32> -> vector<4x128xf32>
    %c0_20 = arith.constant 0 : index
    %c0_21 = arith.constant 0 : index
    %25 = vector.load %arg9[%c0_20, %c0_21] : memref<1x128xf32, #tpu.memory_space<vmem>>, vector<1x128xf32>
    %26 = vector.broadcast %25 : vector<1x128xf32> to vector<4x128xf32>
    %27 = arith.addf %24, %26 : vector<4x128xf32>
    %c0_22 = arith.constant 0 : index
    %c0_23 = arith.constant 0 : index
    %28 = memref.load %arg10[%c0_22, %c0_23] : memref<1x1xf32, #tpu.memory_space<smem>>
    %29 = arith.mulf %12, %12 : vector<2x128xf32>
    %cst_24 = arith.constant dense<0.000000e+00> : vector<2xf32>
    %30 = vector.multi_reduction <add>, %29, %cst_24 [1] : vector<2x128xf32> to vector<2xf32>
    %31 = vector.shape_cast %30 : vector<2xf32> to vector<2x1xf32>
    %32 = math.rsqrt %31 : vector<2x1xf32>
    %33 = vector.broadcast %28 : f32 to vector<2x1xf32>
    %34 = arith.mulf %33, %32 : vector<2x1xf32>
    %35 = vector.broadcast %34 : vector<2x1xf32> to vector<2x128xf32>
    %36 = arith.mulf %12, %35 : vector<2x128xf32>
    %37 = arith.mulf %27, %27 : vector<4x128xf32>
    %cst_25 = arith.constant dense<0.000000e+00> : vector<4xf32>
    %38 = vector.multi_reduction <add>, %37, %cst_25 [1] : vector<4x128xf32> to vector<4xf32>
    %39 = vector.shape_cast %38 : vector<4xf32> to vector<4x1xf32>
    %40 = math.rsqrt %39 : vector<4x1xf32>
    %41 = vector.broadcast %40 : vector<4x1xf32> to vector<4x128xf32>
    %42 = arith.mulf %27, %41 : vector<4x128xf32>
    %cst_26 = arith.constant dense<0.000000e+00> : vector<2x4xf32>
    %43 = tpu.matmul %36, %42, %cst_26 {dimension_numbers = #tpu.dot_dimension_numbers<[1], [1], [0], [0], [0, 0, 1, 0], [], []>} : vector<2x128xf32>, vector<4x128xf32>, vector<2x4xf32> -> vector<2x4xf32>
    %c0_27 = arith.constant 0 : index
    %c0_28 = arith.constant 0 : index
    %44 = vector.load %arg11[%c0_27, %c0_28] : memref<2x4xf32, #tpu.memory_space<vmem>>, vector<2x4xf32>
    tpu.vector_store %arg11[%c0_27, %c0_28], %43 {strides = array<i32>} : memref<2x4xf32, #tpu.memory_space<vmem>>, vector<2x4xf32>,
    return
  }
}

</mosaic_0001>

<bundles_post_ra>
// kernel: clip_test_time_tuning_forward.1
= control target key start
LH: loop header
LB: loop body
LE: loop exit
PB: predicated region body
PF: predicated region fallthrough
CT: control target
= control target key end

     0   :  { %v761_v2 = vmov 0   ;;  %v762_v5 = vmov 0.0   ;;  %vm763_vm0 = vmmov 0   ;;  %s974_s0 = inlined_call_operand.vmem [shape: f32[2,256], index: 0, kind: input, shape index: {}]   ;;  %s975_s1 = inlined_call_operand.vmem [shape: bf16[256,128], index: 1, kind: input, shape index: {}]   ;;  %s976_s2 = inlined_call_operand.vmem [shape: f32[1,128], index: 2, kind: input, shape index: {}]   ;;  %s977_s3 = inlined_call_operand.vmem [shape: bf16[128,128], index: 3, kind: input, shape index: {}]   ;;  %s978_s4 = inlined_call_operand.vmem [shape: f32[1,128], index: 4, kind: input, shape index: {}]   ;;  %s979_s5 = inlined_call_operand.vmem [shape: f32[4,128], index: 5, kind: input, shape index: {}]   ;;  %s980_s6 = inlined_call_operand.vmem [shape: f32[16,128], index: 6, kind: input, shape index: {}]   ;;  %s981_s7 = inlined_call_operand.vmem [shape: f32[4,1], index: 7, kind: input, shape index: {}]   ;;  %s982_s8 = inlined_call_operand.vmem [shape: bf16[128,128], index: 8, kind: input, shape index: {}]   ;;  %s983_s9 = inlined_call_operand.vmem [shape: f32[1,128], index: 9, kind: input, shape index: {}]   ;;  %s984_s10 = inlined_call_operand.<no memory space> [shape: f32[1,1], index: 10, kind: input, shape index: {}]   ;;  %s985_s11 = inlined_call_operand.hbm [shape: f32[2,4], index: 11, kind: output, shape index: {}]  }
   0x1   :  { %v353_v0 = vld [vmem:[%s981_s7] sm:$0xf]  ;;  %v703_v1 = vld [vmem:[%s975_s1 + $0x78] sm:$0xff]   ;;  %702 = vset.pattern.permute.xlu0 %v761_v2  ;;  %v705_v4 = vld [vmem:[%s975_s1 + $0x70] sm:$0xff]   ;;  %653 = vmatprep.subr.bf16.mxu1 %v762_v5 }
   0x2   :  { %356 = vperm.xlu0 %702, %v353_v0   ;;  %611 = vmatprep.subr.bf16.mxu0 %v703_v1  ;;  %v704_v3 = vld [vmem:[%s975_s1 + $0x38] sm:$0xff]   ;;  %v706_v6 = vld [vmem:[%s975_s1 + $0x30] sm:$0xff]   ;;  %v707_v7 = vld [vmem:[%s975_s1 + $0x68] sm:$0xff]  }
   0x3   :  { %612 = vmatpush3.bf16.msra.mxu0 %v704_v3  ;;  %669 = vmatprep.mubr.msk.bf16.mxu1 %vm763_vm0, %v762_v5  ;;  %v708_v8 = vld [vmem:[%s975_s1 + $0x28] sm:$0xff]   ;;  %v709_v9 = vld [vmem:[%s975_s1 + $0x60] sm:$0xff]   ;;  %v711_v11 = vld [vmem:[%s975_s1 + $0x58] sm:$0xff]  }
   0x4   :  { %613 = vmatprep.subr.bf16.mxu0 %v705_v4  ;;  %v710_v10 = vld [vmem:[%s975_s1 + $0x20] sm:$0xff]   ;;  %v712_v12 = vld [vmem:[%s975_s1 + $0x18] sm:$0xff]   ;;  %v713_v13 = vld [vmem:[%s975_s1 + $0x50] sm:$0xff]  }
   0x5   :  { %v575_v14 = vld.sshfl [vmem:[%s974_s0] sm:$0x33 pattern:$0x76325410]  ;;  %v714_v17 = vld [vmem:[%s975_s1 + $0x10] sm:$0xff]   ;;  %v715_v18 = vld [vmem:[%s975_s1 + $0x48] sm:$0xff]  }
   0x6   :  { %v50_v15 = vcombine.high %v575_v14, %v575_v14  ;;  %v716_v19 = vld [vmem:[%s975_s1 + $0x8] sm:$0xff]   ;;  %v717_v20 = vld [vmem:[%s975_s1 + $0x40] sm:$0xff]   ;;  %v727_v21 = vld [vmem:[%s977_s3 + $0x38] sm:$0xff]   ;;  %v53_v24 = vpack.c.bf16 %v575_v14, %v575_v14 }
   0x7   :  { %614 = vmatpush3.bf16.msra.mxu0 %v706_v6  ;;  %v718_v22 = vld [vmem:[%s975_s1] sm:$0xff]   ;;  %654 = vmatpush3.bf16.msra.mxu1 %v727_v21  ;;  %v728_v23 = vld [vmem:[%s977_s3 + $0x30] sm:$0xff]   ;;  %v719_v25 = vld [vmem:[%s982_s8 + $0x38] sm:$0xff]  }
   0x8   :  { %615 = vmatprep.subr.bf16.mxu0 %v707_v7  ;;  %v54_v16 = vpack.c.bf16 %v50_v15, %v50_v15  ;;  %655 = vmatprep.subr.bf16.mxu1 %v762_v5  ;;  %v729_v26 = vld [vmem:[%s977_s3 + $0x28] sm:$0xff]  }
   0xa   :  { %222 = vmatprep.mubr.bf16.mxu0 %v54_v16 }
   0xb   :  { %616 = vmatpush3.bf16.msra.mxu0 %v708_v8  ;;  %656 = vmatpush3.bf16.msra.mxu1 %v728_v23 }
   0xc   :  { %617 = vmatprep.subr.bf16.mxu0 %v709_v9  ;;  %657 = vmatprep.subr.bf16.mxu1 %v762_v5 }
   0xf   :  { %618 = vmatpush3.bf16.msra.mxu0 %v710_v10 }
  0x10   :  { %619 = vmatprep.subr.bf16.mxu0 %v711_v11 }
  0x13   :  { %620 = vmatpush3.bf16.msra.mxu0 %v712_v12 }
  0x14   :  { %621 = vmatprep.subr.bf16.mxu0 %v713_v13 }
  0x17   :  { %622 = vmatpush3.bf16.msra.mxu0 %v714_v17 }
  0x18   :  { %623 = vmatprep.subr.bf16.mxu0 %v715_v18 }
  0x1b   :  { %624 = vmatpush3.bf16.msra.mxu0 %v716_v19 }
  0x1c   :  { %625 = vmatprep.subr.bf16.mxu0 %v717_v20 }
  0x1f   :  { %626 = vmatpush3.bf16.msra.mxu0 %v718_v22 }
  0x20   :  { %673 = vmatprep.subr.bf16.mxu0 %v762_v5 }
  0x21   :  { %17 = vsyncpa [#allocation4], 0  ;;  %v720_v27 = vld [vmem:[%s982_s8 + $0x30] sm:$0xff]   ;;  %658 = vmatpush3.bf16.msra.mxu1 %v729_v26  ;;  %v730_v28 = vld [vmem:[%s977_s3 + $0x20] sm:$0xff]   ;;  %vm483_vm1 = vcmask 1043456   ;;  %vm474_vm2 = vcmask 1041408   ;;  %v479_v17 = vstv %s984_s10 }
  0x22   :  { %223 = vmatmul.mubr.bf16.vlgmr.msra.gmra.mxu0 %v53_v24  ;;  %659 = vmatprep.subr.bf16.mxu1 %v762_v5  ;;  %v721_v29 = vld [vmem:[%s982_s8 + $0x28] sm:$0xff]   ;;  %v731_v30 = vld [vmem:[%s977_s3 + $0x18] sm:$0xff]   ;;  %v722_v31 = vld [vmem:[%s982_s8 + $0x20] sm:$0xff]   ;;  %vm559_vm3 = vcmask 25600  }
  0x23   :  { %674 = vmatpush3.bf16.msra.mxu0 %v719_v25  ;;  %689 = vmatprep.mubr.msk.bf16.mxu0 %vm763_vm0, %v762_v5  ;;  %v732_v32 = vld [vmem:[%s977_s3 + $0x10] sm:$0xff]   ;;  %v723_v33 = vld [vmem:[%s982_s8 + $0x18] sm:$0xff]   ;;  %v725_v35 = vld [vmem:[%s982_s8 + $0x8] sm:$0xff]  }
  0x24   :  { %675 = vmatprep.subr.bf16.mxu0 %v762_v5  ;;  %v724_v34 = vld [vmem:[%s982_s8 + $0x10] sm:$0xff]   ;;  %v726_v36 = vld [vmem:[%s982_s8] sm:$0xff]   ;;  %v343_v38 = vld [vmem:[%s980_s6 + $0x8] sm:$0xff] }
  0x25   :  { %660 = vmatpush3.bf16.msra.mxu1 %v730_v28  ;;  %v342_v37 = vld [vmem:[%s980_s6] sm:$0xff]  ;;  %v733_v41 = vld [vmem:[%s977_s3 + $0x8] sm:$0xff]  }
  0x26   :  { %661 = vmatprep.subr.bf16.mxu1 %v762_v5  ;;  %v344_v39 = vadd.f32 %v343_v38, %v342_v37  ;;  %v734_v43 = vld [vmem:[%s977_s3] sm:$0xff]  }
  0x27   :  { %676 = vmatpush3.bf16.msra.mxu0 %v720_v27  ;;  %v351_v48 = vld [vmem:[%s979_s5] sm:$0xf] }
  0x28   :  { %677 = vmatprep.subr.bf16.mxu0 %v762_v5  ;;  %v345_v40 = vrot.slane %v344_v39, 4  ;;  %v576_v54 = vld [vmem:[%s976_s2] ss:$0 sm:$0xff] }
  0x29   :  { %662 = vmatpush3.bf16.msra.mxu1 %v731_v30  ;;  %v602_v61 = vld [vmem:[%s983_s9] ss:$0 sm:$0xff] }
  0x2a   :  { %663 = vmatprep.subr.bf16.mxu1 %v762_v5  ;;  %v346_v42 = vadd.f32 %v345_v40, %v344_v39  ;;  %v593_v6 = vld [vmem:[%s978_s4] ss:$0 sm:$0xff]  ;;  %s764_s4 = smov [#allocation3]  }
  0x2b   :  { %678 = vmatpush3.bf16.msra.mxu0 %v721_v29  ;;  %s567_s0 = sshll.u32 %s764_s4, 4  ;;  %s568_s0 = int_to_ptr.vmem [resolvable:$true] %s567_s0 }
  0x2c   :  { %679 = vmatprep.subr.bf16.mxu0 %v762_v5  ;;  %v347_v44 = vrot.slane %v346_v42, 2  ;;  %s739_s28 = scalar_lea.vmem %s568_s0, 32  ;;  %p744_p1 = scmp.lt.s32.totalorder %s568_s0, %s568_s0 }
  0x2d   :  { %664 = vmatpush3.bf16.msra.mxu1 %v732_v32  ;;  %p740_p0 = scmp.ne.s32.totalorder %s568_s0, %s739_s28  ;;  %p745_p2 = scmp.lt.s32.totalorder %s739_s28, %s739_s28 }
  0x2e   :  { %665 = vmatprep.subr.bf16.mxu1 %v762_v5  ;;  %v348_v45 = vadd.f32 %v347_v44, %v346_v42 }
  0x2f   :  { %680 = vmatpush3.bf16.msra.mxu0 %v722_v31  ;;  %p746_p3 = por %p745_p2, %p744_p1 }
  0x30   :  { %681 = vmatprep.subr.bf16.mxu0 %v762_v5  ;;  %v349_v46 = vrot.slane %v348_v45, 1 }
  0x31   :  { %666 = vmatpush3.bf16.msra.mxu1 %v733_v41  ;;  %p747_p4 = pnand %p746_p3, %p740_p0 }
  0x32   :  { %667 = vmatprep.subr.bf16.mxu1 %v762_v5  ;;  %v350_v47 = vadd.f32 %v349_v46, %v348_v45 }
  0x33   :  { %682 = vmatpush3.bf16.msra.mxu0 %v723_v33 }
  0x34   :  { %683 = vmatprep.subr.bf16.mxu0 %v762_v5  ;;  %v352_v49 = vadd.f32 %v351_v48, %v350_v47 }
  0x35   :  { %668 = vmatpush3.bf16.msra.mxu1 %v734_v43 }
  0x36   :  { %693 = vmatprep.subr.mxu1 %v762_v5 }
  0x37   :  { %684 = vmatpush3.bf16.msra.mxu0 %v724_v34 }
  0x38   :  { %685 = vmatprep.subr.bf16.mxu0 %v762_v5 }
  0x3b   :  { %686 = vmatpush3.bf16.msra.mxu0 %v725_v35 }
  0x3c   :  { %687 = vmatprep.subr.bf16.mxu0 %v762_v5 }
  0x3f   :  { %688 = vmatpush3.bf16.msra.mxu0 %v726_v36 }
  0x7d   :  { %v357_v50 = vpop.permute.xlu0 %356 }
  0x7e   :  { %v359_v51 = vmul.f32 %v357_v50, %v352_v49 }
  0x80   :  { %v360_v52 = vpack.c.bf16 %v359_v51, %v359_v51 }
  0x82   :  { %690 = vmatmul.mubr.bf16.vlgmr.msra.gmra.mxu0 %v360_v52 }
  0xe2   :  { %v627_v53 = vpop.f32.mrf.mxu0 }
  0xe4   :  { %v628_v55 = vpop.f32.mrf.mxu0 }
  0xe5   :  { %v629_v56 = vadd.f32 %v628_v55, %v627_v53 }
  0xe6   :  { %v630_v57 = vpop.f32.mrf.mxu0 }
  0xe7   :  { %v225_v58 = vadd.f32 %v629_v56, %v576_v54 }
  0xe8   :  { %v631_v59 = vpop.f32.mrf.mxu0 }
  0xe9   :  { %v230_v60 = vpack.c.bf16 %v225_v58, %v225_v58 }
  0xeb   :  { %670 = vmatmul.mubr.bf16.vlgmr.msra.gmra.mxu1 %v230_v60 }
  0xec   :  { %695 = vmatprep.mubr.msk.f32.mxu1 %vm763_vm0, %v762_v5 }
 0x142   :  { %v466_v62 = vpop.f32.mrf.mxu0 }
 0x143   :  { %v467_v63 = vadd.f32 %v602_v61, %v466_v62 }
 0x144   :  { %v691_v0 = vpop.f32.mrf.mxu0 }
 0x145   :  { %v482_v1 = vmul.f32 %v467_v63, %v467_v63 }
 0x146   :  { %v469_v2 = vpop.f32.mrf.mxu0 }
 0x147   :  { %v484_v3 = vsel %vm483_vm1, %v482_v1, 0.0 }
 0x148   :  { %485 = vadd.xlane.f32.xlu0 %v484_v3  ;;  %v692_v4 = vpop.f32.mrf.mxu0 }
 0x1ab   :  { %v336_v7 = vpop.f32.mrf.mxu1 }
 0x1ac   :  { %v337_v8 = vadd.f32 %v593_v6, %v336_v7 }
 0x1ad   :  { %v671_v5 = vpop.f32.mrf.mxu1 }
 0x1ae   :  { %v473_v9 = vmul.f32 %v337_v8, %v337_v8 }
 0x1af   :  { %v339_v10 = vpop.f32.mrf.mxu1 }
 0x1b0   :  { %v475_v11 = vsel %vm474_vm2, %v473_v9, 0.0 }
 0x1b1   :  { %476 = vadd.xlane.f32.xlu1 %v475_v11  ;;  %v672_v12 = vpop.f32.mrf.mxu1 }
 0x1d1   :  { %v486_v13 = vpop.xlane.xlu0 %485 }
 0x1d2   :  { %735 = vrsqrt.f32 %v486_v13 }
 0x1df   :  { %v736_v14 = vpop.eup %735 }
 0x1e0   :  { %v488_v15 = vmul.f32 %v736_v14, %v467_v63 }
 0x1e2   :  { %694 = vmatpush3.xpose.msra.mxu1 %v488_v15 }
 0x23a   :  { %v477_v16 = vpop.xlane.xlu1 %476 }
 0x23b   :  { %737 = vrsqrt.f32 %v477_v16 }
 0x248   :  { %v738_v18 = vpop.eup %737 }
 0x249   :  { %v480_v19 = vmul.f32 %v738_v18, %v479_v17 }
 0x24b   :  { %v481_v20 = vmul.f32 %v480_v19, %v337_v8 }
 0x24d   :  { %696 = vmatmul.mubr.f32.vlgmr.msra.gmra.mxu1 %v481_v20 }
 0x30d   :  { %v555_v21 = vpop.f32.mrf.mxu1 }
 0x30e   :  { %560 = vst.msk [vmem:[#allocation3] sm:$0x3] %vm559_vm3, %v555_v21 }
 0x30f   :  { %v697_v22 = vpop.f32.mrf.mxu1 }
 0x310   :  { %750 = shalt.err (!%p747_p4)
}
 0x311   :  { %570 = dma.vmem_to_hbm [thread:$0]  %s568_s0, 32, %s985_s11, [#allocation4]  }
 0x312   :  { %759 = dma.done.wait [#allocation4], 32  }
 0x313   :  { %760 = vsyncadd [#allocation4], 4294967264 }
 0x314   :  { %574 = vsyncpa [#allocation4], 1 }

</bundles_post_ra>
